<compile_context>
chip_gen: v5e
topology: v5e:2x2
jax: 0.10.0
libtpu: 0.0.40
codegen_flags: <defaults>
</compile_context>

<pallas_src>
import jax
import jax.numpy as jnp
from jax import lax
from jax.experimental import pallas as pl
from jax.experimental.pallas import tpu as pltpu

_PAD_ROWS = 8  # one full vreg of sublanes -> unmasked vst; dead rows sliced off outside


def _fused_forward_kernel(xop_ref, wb_ref, o_ref):
    """VPU-only fused body.

    xop_ref: (3, 8, L) f32 -- [xs, xt, mp] lane-flat operands (pre-gathered in wrapper)
               xs[r, j] = x[n, 2*ho, 0]          with r = n*W + w, j = ho*K + k
               xt[r, j] = x[n, k, w]             (transpose(t1, 2, 1) spread on lanes)
               mp[r, j] = maxpool2x2(x)[n, ho, 0]
    wb_ref : (2, 8, L) f32 -- [w, b] lane-flat conv weight / bias (pre-broadcast sublanes)
    o_ref  : (8, L)    f32 -- o[r, j] = v5[n, k, ho, w]; rows >= N*W are dead padding
    """
    xs = xop_ref[0]
    xt = xop_ref[1]
    mp = xop_ref[2]
    w = wb_ref[0]
    b = wb_ref[1]
    v1 = w * xs + b                                       # conv1x1 stride-2 (Wo == 1)
    o_ref[...] = jnp.maximum(jnp.maximum(v1 - xt, 0.0) - mp, 0.0)


def prepare_params(conv_w, conv_b, H):
    """Parameter-only prep (lane-flat weight/bias); runs once, outside the hot path."""
    K = conv_w.shape[0]
    Ho = H // 2
    L = K * Ho
    w_vec = conv_w.reshape(K).astype(jnp.float32)
    b_vec = conv_b.reshape(K).astype(jnp.float32)
    # lane j = ho*K + k  ->  w[k] / b[k]
    wb = jnp.stack([jnp.tile(w_vec, Ho), jnp.tile(b_vec, Ho)], axis=0)      # (2, L)
    return jnp.asarray(jnp.broadcast_to(wb[:, None, :], (2, _PAD_ROWS, L)),
                       dtype=jnp.float32)                                   # (2, 8, L)


@jax.jit
def model_forward(x, wb_full):
    N, C, H, W = x.shape
    L = wb_full.shape[-1]
    K = H                      # out_channels == H, forced by the forward's broadcasting
    Ho = H // 2
    assert C == 1 and W == 2 and H % 2 == 0, "valid broadcast family: C=1, W=2, H even"
    assert L == K * Ho, "lane-flat width must be K*Ho (128-lane dense for H=16)"
    NW = N * W
    assert NW <= _PAD_ROWS, "batch is baked into one output vreg; use a grid for larger N"

    x3 = x.reshape(N, H, W).astype(jnp.float32)

    # ---- pure-layout gathers (a few KiB of jnp plumbing keeps the kernel VPU-only) ----
    # xs[n, j] = x[n, 2*ho, 0]                  (conv input, Wo == 1 -> column 0 only)
    xs = jnp.repeat(x3[:, 0::2, 0], K, axis=1)                               # (N, L)
    # mp[n, j] = max over the 2x2 window at (2*ho, 0)
    cols = jnp.maximum(x3[:, :, 0], x3[:, :, 1])                             # (N, H)
    mp = jnp.repeat(jnp.maximum(cols[:, 0::2], cols[:, 1::2]), K, axis=1)    # (N, L)
    # xt[n*W + w, j] = x[n, k, w]               (torch.transpose(t1, 2, 1) on lanes)
    xt = jnp.tile(jnp.transpose(x3, (0, 2, 1)).reshape(NW, H), (1, Ho))      # (NW, L)

    def pad_rows(a):
        return jnp.pad(a, ((0, _PAD_ROWS - a.shape[0]), (0, 0)))

    xop = jnp.stack([pad_rows(jnp.repeat(xs, W, axis=0)),
                     pad_rows(xt),
                     pad_rows(jnp.repeat(mp, W, axis=0))], axis=0)           # (3, 8, L)

    out_flat = pl.pallas_call(
        _fused_forward_kernel,
        out_shape=jax.ShapeDtypeStruct((_PAD_ROWS, L), jnp.float32),
        # Whole-array VMEM operands, no grid: one DMA each, one kernel invocation.
        in_specs=[pl.BlockSpec(memory_space=pltpu.MemorySpace.VMEM),
                  pl.BlockSpec(memory_space=pltpu.MemorySpace.VMEM)],
        out_specs=pl.BlockSpec(memory_space=pltpu.MemorySpace.VMEM),
        cost_estimate=pl.CostEstimate(
            flops=6 * _PAD_ROWS * L,
            transcendentals=0,
            bytes_accessed=(3 + 2 + 1) * _PAD_ROWS * L * 4),
    )(xop, wb_full)

    # o[n*W + w, ho*K + k] -> NCHW (N, K, Ho, W): pure layout plumbing on ~2 KiB.
    return out_flat[:NW].reshape(N, W, Ho, K).transpose(0, 3, 2, 1)


def reference_forward(x, conv_w, conv_b):
    """Pure-JAX (XLA) reference matching the PyTorch forward."""
    v1 = lax.conv_general_dilated(
        x, conv_w, window_strides=(2, 2), padding="VALID",
        dimension_numbers=("NCHW", "OIHW", "NCHW"),
        precision=lax.Precision.HIGHEST) + conv_b.reshape(1, -1, 1, 1)
    v2 = v1 - jnp.transpose(x, (0, 2, 1, 3))          # torch.transpose(t1, 2, 1)
    v3 = jnp.maximum(v2, 0.0)
    mp = lax.reduce_window(x, -jnp.inf, lax.max,
                           window_dimensions=(1, 1, 2, 2),
                           window_strides=(1, 1, 2, 2),
                           padding="VALID")
    v4 = v3 - mp
    return jnp.maximum(v4, 0.0)


if __name__ == "__main__":
    key = jax.random.PRNGKey(0)
    kx, kw, kb = jax.random.split(key, 3)

    N, C, H, W = 2, 1, 16, 2        # NCHW; valid config for the forward's broadcasting
    K = H                           # out_channels must equal H

    x = jax.random.normal(kx, (N, C, H, W), dtype=jnp.float32)
    conv_w = jax.random.normal(kw, (K, C, 1, 1), dtype=jnp.float32) / (C ** 0.5)
    conv_b = jax.random.normal(kb, (K,), dtype=jnp.float32) * 0.1

    wb_full = prepare_params(conv_w, conv_b, H)       # parameter-only, done once

    out = model_forward(x, wb_full)
    out = jax.block_until_ready(out)

    ref = reference_forward(x, conv_w, conv_b)
    assert out.shape == ref.shape == (N, K, H // 2, W), (out.shape, ref.shape)
    if not jnp.allclose(out, ref, atol=1e-5, rtol=1e-5):
        raise AssertionError("Pallas kernel output does not match reference")

    print("KERNEL_OK")
</pallas_src>

<mosaic_0001>
module attributes {stable_mosaic.version = 11 : i64} {
  func.func @_fused_forward_kernel(%arg0: memref<3x8x128xf32, #tpu.memory_space<vmem>>, %arg1: memref<2x8x128xf32, #tpu.memory_space<vmem>>, %arg2: memref<8x128xf32, #tpu.memory_space<vmem>>) attributes {dimension_semantics = [], scalar_prefetch = 0 : i64, scratch_operands = 0 : i64, tpu.core_type = #tpu.core_type<tc>} {
    %c0 = arith.constant 0 : index
    %c0_0 = arith.constant 0 : index
    %c0_1 = arith.constant 0 : index
    %0 = vector.load %arg0[%c0, %c0_0, %c0_1] : memref<3x8x128xf32, #tpu.memory_space<vmem>>, vector<1x8x128xf32>
    %1 = vector.shape_cast %0 : vector<1x8x128xf32> to vector<8x128xf32>
    %c1 = arith.constant 1 : index
    %c0_2 = arith.constant 0 : index
    %c0_3 = arith.constant 0 : index
    %2 = vector.load %arg0[%c1, %c0_2, %c0_3] : memref<3x8x128xf32, #tpu.memory_space<vmem>>, vector<1x8x128xf32>
    %3 = vector.shape_cast %2 : vector<1x8x128xf32> to vector<8x128xf32>
    %c2 = arith.constant 2 : index
    %c0_4 = arith.constant 0 : index
    %c0_5 = arith.constant 0 : index
    %4 = vector.load %arg0[%c2, %c0_4, %c0_5] : memref<3x8x128xf32, #tpu.memory_space<vmem>>, vector<1x8x128xf32>
    %5 = vector.shape_cast %4 : vector<1x8x128xf32> to vector<8x128xf32>
    %c0_6 = arith.constant 0 : index
    %c0_7 = arith.constant 0 : index
    %c0_8 = arith.constant 0 : index
    %6 = vector.load %arg1[%c0_6, %c0_7, %c0_8] : memref<2x8x128xf32, #tpu.memory_space<vmem>>, vector<1x8x128xf32>
    %7 = vector.shape_cast %6 : vector<1x8x128xf32> to vector<8x128xf32>
    %c1_9 = arith.constant 1 : index
    %c0_10 = arith.constant 0 : index
    %c0_11 = arith.constant 0 : index
    %8 = vector.load %arg1[%c1_9, %c0_10, %c0_11] : memref<2x8x128xf32, #tpu.memory_space<vmem>>, vector<1x8x128xf32>
    %9 = vector.shape_cast %8 : vector<1x8x128xf32> to vector<8x128xf32>
    %10 = arith.mulf %7, %1 : vector<8x128xf32>
    %11 = arith.addf %10, %9 : vector<8x128xf32>
    %12 = arith.subf %11, %3 : vector<8x128xf32>
    %cst = arith.constant 0.000000e+00 : f32
    %13 = vector.broadcast %cst : f32 to vector<8x128xf32>
    %14 = arith.maximumf %12, %13 : vector<8x128xf32>
    %15 = arith.subf %14, %5 : vector<8x128xf32>
    %cst_12 = arith.constant 0.000000e+00 : f32
    %16 = vector.broadcast %cst_12 : f32 to vector<8x128xf32>
    %17 = arith.maximumf %15, %16 : vector<8x128xf32>
    %c0_13 = arith.constant 0 : index
    %c0_14 = arith.constant 0 : index
    %18 = vector.load %arg2[%c0_13, %c0_14] : memref<8x128xf32, #tpu.memory_space<vmem>>, vector<8x128xf32>
    tpu.vector_store %arg2[%c0_13, %c0_14], %17 {strides = array<i32>} : memref<8x128xf32, #tpu.memory_space<vmem>>, vector<8x128xf32>,
    return
  }
}

</mosaic_0001>

<bundles_post_ra>
// kernel: tile.7
= control target key start
LH: loop header
LB: loop body
LE: loop exit
PB: predicated region body
PF: predicated region fallthrough
CT: control target
= control target key end

     0   :  { %s67_s8 = smov 112   ;;  %s68_s11 = smov 80   ;;  %vm3_vm0 = vcmask 130048   ;;  %vm9_vm1 = vcmask 1048448   ;;  %vm15_vm2 = vcmask 917248   ;;  %vm21_vm3 = vcmask 786048   ;;  %s111_s0 = inlined_call_operand.vmem [shape: f32[4,8,16], index: 0, kind: input, shape index: {}]   ;;  %s112_s1 = inlined_call_operand.vmem [shape: f32[4,128], index: 1, kind: output, shape index: {}]  }
   0x1   :  { %v53_v0 = vld [vmem:[%s111_s0 + $0x7] ss:$8 sm:$0xf]   ;;  %v55_v1 = vld [vmem:[%s111_s0 + $0x5] ss:$8 sm:$0xf]  }
   0x2   :  { %7 = vrot.lane.b32.xlu0 %v53_v0, %s67_s8  ;;  %19 = vrot.lane.b32.xlu1 %v55_v1, %s68_s11  ;;  %v57_v2 = vld [vmem:[%s111_s0 + $0x3] ss:$8 sm:$0xf]   ;;  %s69_s14 = smov 48   ;;  %s70_s19 = smov 96   ;;  %vm27_vm4 = vcmask 654848  }
   0x3   :  { %31 = vrot.lane.b32.xlu2 %v57_v2, %s69_s14  ;;  %v54_v3 = vld [vmem:[%s111_s0 + $0x6] ss:$8 sm:$0xf]   ;;  %v56_v4 = vld [vmem:[%s111_s0 + $0x4] ss:$8 sm:$0xf]  }
   0x4   :  { %s71_s20 = smov 64   ;;  %v58_v5 = vld [vmem:[%s111_s0 + $0x2] ss:$8 sm:$0xf]   ;;  %s72_s23 = smov 32   ;;  %vm33_vm5 = vcmask 523648  }
   0x5   :  { %v59_v6 = vld [vmem:[%s111_s0 + $0x1] ss:$8 sm:$0xf]   ;;  %s73_s26 = smov 16   ;;  %vm39_vm6 = vcmask 392448   ;;  %vm45_vm7 = vcmask 261248  }
   0x6   :  { %v2_v7 = vld [vmem:[%s111_s0] ss:$8 sm:$0xf]  }
   0x7   :  { %4 = vst.msk [vmem:[#allocation0] sm:$0xf] %vm3_vm0, %v2_v7  }
   0xa   :  { %13 = vrot.lane.b32.xlu0 %v54_v3, %s70_s19  ;;  %25 = vrot.lane.b32.xlu1 %v56_v4, %s71_s20 }
   0xb   :  { %37 = vrot.lane.b32.xlu2 %v58_v5, %s72_s23 }
  0x12   :  { %43 = vrot.lane.b32.xlu0 %v59_v6, %s73_s26 }
  0x5d   :  { %v32_v8 = vpop.permute.xlu2 %31  }
  0x65   :  { %v38_v9 = vpop.permute.xlu2 %37  }
  0x74   :  { %v8_v10 = vpop.permute.xlu0 %7   ;;  %v20_v11 = vpop.permute.xlu1 %19  }
  0x75   :  { %10 = vst.msk [vmem:[#allocation0] sm:$0xf] %vm9_vm1, %v8_v10  }
  0x7c   :  { %v14_v12 = vpop.permute.xlu0 %13   ;;  %v26_v13 = vpop.permute.xlu1 %25  }
  0x7d   :  { %16 = vst.msk [vmem:[#allocation0] sm:$0xf] %vm15_vm2, %v14_v12  }
  0x7e   :  { %22 = vst.msk [vmem:[#allocation0] sm:$0xf] %vm21_vm3, %v20_v11  }
  0x7f   :  { %28 = vst.msk [vmem:[#allocation0] sm:$0xf] %vm27_vm4, %v26_v13  }
  0x80   :  { %34 = vst.msk [vmem:[#allocation0] sm:$0xf] %vm33_vm5, %v32_v8  }
  0x81   :  { %40 = vst.msk [vmem:[#allocation0] sm:$0xf] %vm39_vm6, %v38_v9  }
  0x84   :  { %v44_v14 = vpop.permute.xlu0 %43  }
  0x85   :  { %46 = vst.msk [vmem:[#allocation0] sm:$0xf] %vm45_vm7, %v44_v14  }
  0x8c   :  { %v49_v15 = vld [vmem:[#allocation0] sm:$0xf] }
  0x8d   :  { %52 = vst [vmem:[%s112_s1] sm:$0xf] %v49_v15 }

// kernel: model_forward.1
= control target key start
LH: loop header
LB: loop body
LE: loop exit
PB: predicated region body
PF: predicated region fallthrough
CT: control target
= control target key end

     0   :  { %s66_s0 = inlined_call_operand.vmem [shape: f32[3,8,128], index: 0, kind: input, shape index: {}]   ;;  %s67_s1 = inlined_call_operand.vmem [shape: f32[2,8,128], index: 1, kind: input, shape index: {}]   ;;  %s68_s2 = inlined_call_operand.vmem [shape: f32[8,128], index: 2, kind: output, shape index: {}]  }
   0x1   :  { %v11_v0 = vld [vmem:[%s66_s0] sm:$0xff]  ;;  %v32_v2 = vld [vmem:[%s67_s1 + $0x8] sm:$0xff]  ;;  %v31_v7 = vld [vmem:[%s66_s0 + $0x10] sm:$0xff] }
   0x2   :  { %v16_v1 = vld [vmem:[%s67_s1] sm:$0xff]  ;;  %v30_v4 = vld [vmem:[%s66_s0 + $0x8] sm:$0xff] }
   0x3   :  { %v19_v3 = vmul.f32 %v16_v1, %v11_v0 }
   0x5   :  { %v20_v5 = vadd.f32 %v32_v2, %v19_v3 }
   0x7   :  { %v21_v6 = vsub.f32 %v20_v5, %v30_v4 }
   0x9   :  { %v22_v8 = vmax.f32 %v21_v6, 0.0 }
   0xb   :  { %v23_v9 = vsub.f32 %v22_v8, %v31_v7 }
   0xd   :  { %v24_v10 = vmax.f32 %v23_v9, 0.0 }
   0xf   :  { %25 = vst [vmem:[%s68_s2] sm:$0xff] %v24_v10 }

</bundles_post_ra>
